<compile_context>
chip_gen: v6e
topology: v6e:2x2x1
jax: 0.10.0
libtpu: 0.0.40
codegen_flags: <defaults>
</compile_context>

<pallas_src>
import jax
import jax.numpy as jnp
import numpy as np
from jax.experimental import pallas as pl
from jax.experimental.pallas import tpu as pltpu


# ----------------------------------------------------------------------------
# Kernel A: CARM attention, BT batch items per grid step (all 2-D, no
# in-kernel reshapes).
#   flow_ref : (BT*S*L, F5)  flattened flow-sequence embeddings
#   seqc_ref : (BT*S, 80)    precomputed seq_emb @ W1[F5:] + b1
#   mask_ref : (BT*S*L, 1)   0 = padded flow item
#   gb_ref   : (BT*S*L, BT*S)  block-diag group indicator
#   gbt_ref  : (BT*S, BT*S*L)  its transpose
#   r_ref    : (BT, BT*S)      per-item row-sum indicator
#   w1f_ref  : (F5, 80)      flow half of carm layer-1 weight
#   w2row    : (1, 80)       carm layer-2 weight (transposed)
#   b2_ref   : (1, 1)
#   rep_ref  : (BT, F5)      output: sum over s of attention-weighted flow emb
# ----------------------------------------------------------------------------
def carm_kernel(flow_ref, seqc_ref, mask_ref, gb_ref, gbt_ref, r_ref,
                w1f_ref, w2row_ref, b2_ref, rep_ref):
    flow = flow_ref[...]                                         # (N, F5)

    # carm layer 1: flow part on the MXU; seq part precomputed outside and
    # broadcast onto the flow rows with the block-diagonal indicator matmul.
    h = jnp.dot(flow, w1f_ref[...], preferred_element_type=jnp.float32)
    h = h + jnp.dot(gb_ref[...], seqc_ref[...],
                    preferred_element_type=jnp.float32)          # (N, 80)
    h = jnp.maximum(h, 0.0)

    # carm layer 2 (80 -> 1): VPU multiply + lane reduce (avoids N=1 MXU push).
    logits = jnp.sum(h * w2row_ref[...], axis=-1, keepdims=True) + b2_ref[...]

    padding_num = jnp.float32(-2 ** 30 + 1)
    masked = jnp.where(mask_ref[...] != 0.0, logits, padding_num)  # (N, 1)

    # Softmax per (b, s)-group of L rows.  Subtracting the *tile-global* max is
    # mathematically identical (softmax shift-invariance within each group) and
    # avoids a grouped max / in-kernel relayout.  (Fully-masked groups would
    # yield 0/0, same degenerate caveat as the reference attending to padding.)
    m = jnp.max(masked, axis=0, keepdims=True)                   # (1, 1)
    e = jnp.exp(masked - m)                                      # (N, 1)

    denom = jnp.dot(gbt_ref[...], e,
                    preferred_element_type=jnp.float32)          # (BT*S, 1)
    num = jnp.dot(gbt_ref[...], e * flow,
                  preferred_element_type=jnp.float32)            # (BT*S, F5)
    rep = num / denom                                            # (BT*S, F5)

    # Sum over s within each batch item -> one dense (BT, F5) tile.
    rep_ref[...] = jnp.dot(r_ref[...], rep,
                           preferred_element_type=jnp.float32)


def _pick_carm_tile(B):
    """Batch-items per grid step; keeps BlockSpec dims (8,128)-legal."""
    if B <= 8:
        return B          # whole batch in one step (block dims == full dims)
    if B % 8 == 0:
        return 8          # multiple-of-8 tile
    return B              # fallback: single step


def carm_rep_sum(flow_flat, seq_c_flat, mask_flat, w1f, w2row, b2, B, S, L):
    """Returns sum_s of attention-weighted flow embeddings, shape (B, F5)."""
    SL = S * L
    F5 = flow_flat.shape[-1]
    H = seq_c_flat.shape[-1]
    BT = _pick_carm_tile(B)

    # Indicator matrices encoding the (b, s)-group structure of the flattened
    # rows of one tile; shared across grid steps (constant index map).
    G = (jnp.arange(SL)[:, None] // L == jnp.arange(S)[None, :]
         ).astype(jnp.float32)                                   # (SL, S)
    eye = jnp.eye(BT, dtype=jnp.float32)
    Gb = jnp.kron(eye, G)                                        # (BT*SL, BT*S)
    Gbt = Gb.T                                                   # (BT*S, BT*SL)
    R = jnp.kron(eye, jnp.ones((1, S), jnp.float32))             # (BT, BT*S)

    const = lambda arr: pl.BlockSpec(arr.shape, lambda b: (0, 0))

    out = pl.pallas_call(
        carm_kernel,
        out_shape=jax.ShapeDtypeStruct((B, F5), jnp.float32),
        grid_spec=pltpu.PrefetchScalarGridSpec(
            num_scalar_prefetch=0,
            grid=(B // BT,),
            in_specs=[
                pl.BlockSpec((BT * SL, F5), lambda b: (b, 0)),
                pl.BlockSpec((BT * S, H), lambda b: (b, 0)),
                pl.BlockSpec((BT * SL, 1), lambda b: (b, 0)),
                const(Gb), const(Gbt), const(R),
                const(w1f), const(w2row), const(b2),
            ],
            out_specs=pl.BlockSpec((BT, F5), lambda b: (b, 0)),
        ),
        compiler_params=pltpu.CompilerParams(
            dimension_semantics=("parallel",)),
    )(flow_flat, seq_c_flat, mask_flat, Gb, Gbt, R, w1f, w2row, b2)
    return out


# ----------------------------------------------------------------------------
# Kernel B: user/photo encoder MLP towers + dot-product logits,
# tiled over batch rows so DMA pipelines against the matmuls.
# ----------------------------------------------------------------------------
def encoder_kernel(u_ref, p_ref,
                   uw1, ub1, uw2, ub2, uw3, ub3,
                   pw1, pb1, pw2, pb2, pw3, pb3,
                   out_ref):
    u = u_ref[...]
    h = jnp.maximum(jnp.dot(u, uw1[...], preferred_element_type=jnp.float32) + ub1[...], 0.0)
    h = jnp.maximum(jnp.dot(h, uw2[...], preferred_element_type=jnp.float32) + ub2[...], 0.0)
    u_out = jnp.dot(h, uw3[...], preferred_element_type=jnp.float32) + ub3[...]

    p = p_ref[...]
    g = jnp.maximum(jnp.dot(p, pw1[...], preferred_element_type=jnp.float32) + pb1[...], 0.0)
    g = jnp.maximum(jnp.dot(g, pw2[...], preferred_element_type=jnp.float32) + pb2[...], 0.0)
    p_out = jnp.dot(g, pw3[...], preferred_element_type=jnp.float32) + pb3[...]

    out_ref[...] = jnp.sum(u_out * p_out, axis=-1, keepdims=True)


def encoder_logits(u_input, p_input, p):
    B, Du = u_input.shape
    Dp = p_input.shape[1]
    # Row tile: full batch for small B, multiple-of-8 tile for large batches
    # (keeps the second-to-last block dim (8,128)-legal and bounds VMEM).
    tb = B if B <= 256 else 256
    grid = (pl.cdiv(B, tb),)
    const = lambda shape: pl.BlockSpec(shape, lambda i: (0, 0))

    out = pl.pallas_call(
        encoder_kernel,
        out_shape=jax.ShapeDtypeStruct((B, 1), jnp.float32),
        grid_spec=pltpu.PrefetchScalarGridSpec(
            num_scalar_prefetch=0,
            grid=grid,
            in_specs=[
                pl.BlockSpec((tb, Du), lambda i: (i, 0)),
                pl.BlockSpec((tb, Dp), lambda i: (i, 0)),
                const(p['u_w1'].shape), const(p['u_b1'].shape),
                const(p['u_w2'].shape), const(p['u_b2'].shape),
                const(p['u_w3'].shape), const(p['u_b3'].shape),
                const(p['p_w1'].shape), const(p['p_b1'].shape),
                const(p['p_w2'].shape), const(p['p_b2'].shape),
                const(p['p_w3'].shape), const(p['p_b3'].shape),
            ],
            out_specs=pl.BlockSpec((tb, 1), lambda i: (i, 0)),
        ),
        compiler_params=pltpu.CompilerParams(
            dimension_semantics=("parallel",)),
    )(u_input, p_input,
      p['u_w1'], p['u_b1'], p['u_w2'], p['u_b2'], p['u_w3'], p['u_b3'],
      p['p_w1'], p['p_b1'], p['p_w2'], p['p_b2'], p['p_w3'], p['p_b3'])
    return out[:, 0]


# ----------------------------------------------------------------------------
# Full forward (embedding gathers + concat are plain-JAX glue around kernels).
# ----------------------------------------------------------------------------
def dssm_ubm_forward(params, inputs):
    (req_wday, req_hour, req_min, uid, did, gender, age, province,
     vid, aid, cate_two, cate_one, upload_type, up_wday, up_hour, up_min,
     seq_arr, seq_mask, seq_len, flow_seq_arr, flow_seq_mask) = inputs
    p = params
    E = p['wday'].shape[1]
    F5 = 5 * E
    take = lambda t, i: jnp.take(t, i, axis=0)

    # TODO(synk): embedding gathers (data-dependent) are kept in plain JAX.
    req_wda_emb = take(p['wday'], req_wday)
    req_hou_emb = take(p['hour'], req_hour)
    req_min_emb = take(p['minute'], req_min)
    uid_emb = take(p['uid'], uid)
    did_emb = take(p['did'], did)
    gen_emb = take(p['gender'], gender)
    age_emb = take(p['age'], age)
    pro_emb = take(p['province'], province)
    vid_emb = take(p['vid'], vid)
    aid_emb = take(p['aid'], aid)
    cate_two_emb = take(p['cate2'], cate_two)
    cate_one_emb = take(p['cate1'], cate_one)
    up_emb = take(p['uptype'], upload_type)
    up_wda_emb = take(p['wday'], up_wday)
    up_hou_emb = take(p['hour'], up_hour)
    up_min_emb = take(p['minute'], up_min)

    seq_len_f = seq_len.astype(jnp.float32)[:, None]             # (B, 1)

    seq_emb = jnp.concatenate([
        take(p['vid'], seq_arr[:, :, 0]),
        take(p['aid'], seq_arr[:, :, 1]),
        take(p['cate2'], seq_arr[:, :, 2]),
        take(p['cate1'], seq_arr[:, :, 3]),
        take(p['uptype'], seq_arr[:, :, 4])], axis=2)            # (B, S, 5E)

    flow_seq_emb = jnp.concatenate([
        take(p['vid'], flow_seq_arr[:, :, :, 0]),
        take(p['aid'], flow_seq_arr[:, :, :, 1]),
        take(p['cate2'], flow_seq_arr[:, :, :, 2]),
        take(p['cate1'], flow_seq_arr[:, :, :, 3]),
        take(p['uptype'], flow_seq_arr[:, :, :, 4])], axis=3)    # (B, S, L, 5E)

    B, S, L, _ = flow_seq_emb.shape

    # ---- CARM attention (Pallas kernel A) --------------------------------
    flow_flat = flow_seq_emb.reshape(B * S * L, F5)
    mask_flat = flow_seq_mask.astype(jnp.float32).reshape(B * S * L, 1)

    # Hoisted seq-side contribution of carm layer 1 (one big matmul, b1 folded).
    w1f = p['carm_w1'][:F5]
    w1s = p['carm_w1'][F5:]
    seq_c_flat = seq_emb.reshape(B * S, F5) @ w1s + p['carm_b1']  # (B*S, 80)

    w2row = p['carm_w2'].reshape(1, -1)                           # (1, 80)

    rep_sum = carm_rep_sum(flow_flat, seq_c_flat, mask_flat,
                           w1f, w2row, p['carm_b2'], B, S, L)     # (B, F5)

    # seq_emb sum is independent of the attention -> plain JAX.
    seq_sum = jnp.sum(seq_emb, axis=1)                            # (B, F5)
    seq_emb_mean = seq_sum / seq_len_f
    rep_mean = rep_sum / seq_len_f

    # ---- encoder towers + logits (Pallas kernel B) -----------------------
    u_input = jnp.concatenate([req_wda_emb, req_hou_emb, req_min_emb, uid_emb,
                               did_emb, gen_emb, age_emb, pro_emb,
                               seq_emb_mean, rep_mean], axis=1)   # (B, 18E)
    p_input = jnp.concatenate([vid_emb, aid_emb, cate_two_emb, cate_one_emb,
                               up_emb, up_wda_emb, up_hou_emb, up_min_emb],
                              axis=1)                             # (B, 8E)

    return encoder_logits(u_input, p_input, p)                    # (B,)


# ----------------------------------------------------------------------------
# Pure-JAX reference (mirrors the PyTorch forward) for correctness checking.
# ----------------------------------------------------------------------------
def reference_forward(params, inputs):
    (req_wday, req_hour, req_min, uid, did, gender, age, province,
     vid, aid, cate_two, cate_one, upload_type, up_wday, up_hour, up_min,
     seq_arr, seq_mask, seq_len, flow_seq_arr, flow_seq_mask) = inputs
    p = params
    take = lambda t, i: jnp.take(t, i, axis=0)

    req_wda = take(p['wday'], req_wday); req_hou = take(p['hour'], req_hour)
    req_minu = take(p['minute'], req_min)
    uid_e = take(p['uid'], uid); did_e = take(p['did'], did)
    gen_e = take(p['gender'], gender); age_e = take(p['age'], age)
    pro_e = take(p['province'], province)
    vid_e = take(p['vid'], vid); aid_e = take(p['aid'], aid)
    c2_e = take(p['cate2'], cate_two); c1_e = take(p['cate1'], cate_one)
    up_e = take(p['uptype'], upload_type)
    upw_e = take(p['wday'], up_wday); uph_e = take(p['hour'], up_hour)
    upm_e = take(p['minute'], up_min)

    seq_len_f = seq_len.astype(jnp.float32)[:, None]
    seq_emb = jnp.concatenate([take(p['vid'], seq_arr[:, :, 0]),
                               take(p['aid'], seq_arr[:, :, 1]),
                               take(p['cate2'], seq_arr[:, :, 2]),
                               take(p['cate1'], seq_arr[:, :, 3]),
                               take(p['uptype'], seq_arr[:, :, 4])], axis=2)
    seq_emb_mean = jnp.sum(seq_emb, axis=1) / seq_len_f

    flow_emb = jnp.concatenate([take(p['vid'], flow_seq_arr[:, :, :, 0]),
                                take(p['aid'], flow_seq_arr[:, :, :, 1]),
                                take(p['cate2'], flow_seq_arr[:, :, :, 2]),
                                take(p['cate1'], flow_seq_arr[:, :, :, 3]),
                                take(p['uptype'], flow_seq_arr[:, :, :, 4])],
                               axis=3)
    L = flow_emb.shape[2]
    seq_emb_4 = jnp.broadcast_to(seq_emb[:, :, None, :],
                                 seq_emb.shape[:2] + (L, seq_emb.shape[-1]))
    din_in = jnp.concatenate([flow_emb, seq_emb_4], axis=3)
    h = jax.nn.relu(din_in @ p['carm_w1'] + p['carm_b1'])
    logits = h @ p['carm_w2'] + p['carm_b2']          # (B,S,L,1)
    logits = jnp.swapaxes(logits, 3, 2)               # (B,S,1,L)
    mask_bool = (flow_seq_mask != 0)[:, :, None, :]
    logits = jnp.where(mask_bool, logits, jnp.float32(-2 ** 30 + 1))
    scores = jax.nn.softmax(logits, axis=3)
    rep = jnp.matmul(scores, flow_emb)[:, :, 0, :]    # (B,S,5E)
    rep_mean = jnp.sum(rep, axis=1) / seq_len_f

    u_input = jnp.concatenate([req_wda, req_hou, req_minu, uid_e, did_e,
                               gen_e, age_e, pro_e, seq_emb_mean, rep_mean],
                              axis=1)
    p_input = jnp.concatenate([vid_e, aid_e, c2_e, c1_e, up_e,
                               upw_e, uph_e, upm_e], axis=1)

    def tower(x, w1, b1, w2, b2, w3, b3):
        x = jax.nn.relu(x @ w1 + b1)
        x = jax.nn.relu(x @ w2 + b2)
        return x @ w3 + b3

    u_out = tower(u_input, p['u_w1'], p['u_b1'], p['u_w2'], p['u_b2'],
                  p['u_w3'], p['u_b3'])
    p_out = tower(p_input, p['p_w1'], p['p_b1'], p['p_w2'], p['p_b2'],
                  p['p_w3'], p['p_b3'])
    return jnp.sum(u_out * p_out, axis=1)


# ----------------------------------------------------------------------------
# Deterministic parameter construction.
# ----------------------------------------------------------------------------
def make_emb(key, n_rows, e, padding_idx):
    w = jax.random.normal(key, (n_rows, e), jnp.float32) * 0.1
    return w.at[padding_idx].set(0.0)


def make_linear(key, fan_in, fan_out):
    kw, kb = jax.random.split(key)
    w = jax.random.normal(kw, (fan_in, fan_out), jnp.float32) / np.sqrt(fan_in)
    b = jax.random.normal(kb, (1, fan_out), jnp.float32) * 0.01
    return w, b


def build_params(key, E, id_cnt):
    keys = jax.random.split(key, 22)
    p = {}
    p['uid'] = make_emb(keys[0], id_cnt['user_id'] + 2, E, 0)
    p['did'] = make_emb(keys[1], id_cnt['device_id'] + 2, E, 0)
    p['gender'] = make_emb(keys[2], id_cnt['gender'] + 2, E, 0)
    p['age'] = make_emb(keys[3], id_cnt['age'] + 2, E, 0)
    p['province'] = make_emb(keys[4], id_cnt['province'] + 2, E, 0)
    p['vid'] = make_emb(keys[5], id_cnt['photo_id'] + 2, E, 0)
    p['aid'] = make_emb(keys[6], id_cnt['author_id'] + 2, E, 0)
    p['cate2'] = make_emb(keys[7], id_cnt['category_level_two'] + 2, E, 0)
    p['cate1'] = make_emb(keys[8], id_cnt['category_level_one'] + 2, E, 2)
    p['uptype'] = make_emb(keys[9], id_cnt['upload_type'] + 2, E, 0)
    p['wday'] = make_emb(keys[10], 7 + 2, E, 0)
    p['hour'] = make_emb(keys[11], 24 + 2, E, 0)
    p['minute'] = make_emb(keys[12], 60 + 2, E, 0)

    p['carm_w1'], p['carm_b1'] = make_linear(keys[13], 10 * E, 80)
    p['carm_w2'], p['carm_b2'] = make_linear(keys[14], 80, 1)

    p['u_w1'], p['u_b1'] = make_linear(keys[15], 18 * E, 128)
    p['u_w2'], p['u_b2'] = make_linear(keys[16], 128, 64)
    p['u_w3'], p['u_b3'] = make_linear(keys[17], 64, 32)

    p['p_w1'], p['p_b1'] = make_linear(keys[18], 8 * E, 128)
    p['p_w2'], p['p_b2'] = make_linear(keys[19], 128, 64)
    p['p_w3'], p['p_b3'] = make_linear(keys[20], 64, 32)
    return p


if __name__ == "__main__":
    E, B, S, L = 8, 2, 4, 8   # emb_dim, batch, seq_len, flow_seq_len
    id_cnt = {'user_id': 30, 'device_id': 30, 'gender': 4, 'age': 10,
              'province': 20, 'photo_id': 50, 'author_id': 40,
              'category_level_two': 20, 'category_level_one': 10,
              'upload_type': 6}

    root = jax.random.PRNGKey(0)
    kp, kd = jax.random.split(root)
    params = build_params(kp, E, id_cnt)

    ks = jax.random.split(kd, 24)
    ri = lambda k, shape, n: jax.random.randint(k, shape, 1, n, dtype=jnp.int32)

    request_wday = ri(ks[0], (B,), 7 + 2)
    request_hour = ri(ks[1], (B,), 24 + 2)
    request_min = ri(ks[2], (B,), 60 + 2)
    uid = ri(ks[3], (B,), id_cnt['user_id'] + 2)
    did = ri(ks[4], (B,), id_cnt['device_id'] + 2)
    gender = ri(ks[5], (B,), id_cnt['gender'] + 2)
    age = ri(ks[6], (B,), id_cnt['age'] + 2)
    province = ri(ks[7], (B,), id_cnt['province'] + 2)
    vid = ri(ks[8], (B,), id_cnt['photo_id'] + 2)
    aid = ri(ks[9], (B,), id_cnt['author_id'] + 2)
    cate_two = ri(ks[10], (B,), id_cnt['category_level_two'] + 2)
    cate_one = ri(ks[11], (B,), id_cnt['category_level_one'] + 2)
    upload_type = ri(ks[12], (B,), id_cnt['upload_type'] + 2)
    upload_ts_wday = ri(ks[13], (B,), 7 + 2)
    upload_ts_hour = ri(ks[14], (B,), 24 + 2)
    upload_ts_min = ri(ks[15], (B,), 60 + 2)

    seq_arr = jnp.stack([
        ri(ks[16], (B, S), id_cnt['photo_id'] + 2),
        ri(ks[17], (B, S), id_cnt['author_id'] + 2),
        ri(ks[18], (B, S), id_cnt['category_level_two'] + 2),
        ri(ks[19], (B, S), id_cnt['category_level_one'] + 2),
        ri(ks[20], (B, S), id_cnt['upload_type'] + 2)], axis=-1)   # (B,S,5)
    seq_mask = jnp.ones((B, S), jnp.int32)
    seq_len = jnp.array([S, S - 1], dtype=jnp.int32)

    flow_seq_arr = jnp.stack([
        ri(ks[21], (B, S, L), id_cnt['photo_id'] + 2),
        ri(ks[22], (B, S, L), id_cnt['author_id'] + 2),
        ri(ks[23], (B, S, L), id_cnt['category_level_two'] + 2),
        ri(ks[21], (B, S, L), id_cnt['category_level_one'] + 2),
        ri(ks[22], (B, S, L), id_cnt['upload_type'] + 2)], axis=-1)  # (B,S,L,5)
    flow_seq_mask = jax.random.bernoulli(ks[23], 0.7, (B, S, L)).astype(jnp.int32)
    flow_seq_mask = flow_seq_mask.at[:, :, 0].set(1)

    inputs = (request_wday, request_hour, request_min, uid, did, gender, age,
              province, vid, aid, cate_two, cate_one, upload_type,
              upload_ts_wday, upload_ts_hour, upload_ts_min,
              seq_arr, seq_mask, seq_len, flow_seq_arr, flow_seq_mask)

    logits = dssm_ubm_forward(params, inputs)
    logits = jax.block_until_ready(logits)

    ref = reference_forward(params, inputs)
    assert logits.shape == (B,)
    np.testing.assert_allclose(np.asarray(logits), np.asarray(ref),
                               rtol=1e-4, atol=1e-4)
    print("KERNEL_OK")
</pallas_src>

<mosaic_0001>
module attributes {stable_mosaic.version = 11 : i64} {
  func.func @carm_kernel(%arg0: i32, %arg1: memref<64x40xf32, #tpu.memory_space<vmem>>, %arg2: memref<8x80xf32, #tpu.memory_space<vmem>>, %arg3: memref<64x1xf32, #tpu.memory_space<vmem>>, %arg4: memref<64x8xf32, #tpu.memory_space<vmem>>, %arg5: memref<8x64xf32, #tpu.memory_space<vmem>>, %arg6: memref<2x8xf32, #tpu.memory_space<vmem>>, %arg7: memref<40x80xf32, #tpu.memory_space<vmem>>, %arg8: memref<1x80xf32, #tpu.memory_space<vmem>>, %arg9: memref<1x1xf32, #tpu.memory_space<vmem>>, %arg10: memref<2x40xf32, #tpu.memory_space<vmem>>) attributes {dimension_semantics = [#tpu.dimension_semantics<parallel>], iteration_bounds = array<i64: 1>, scalar_prefetch = 0 : i64, scratch_operands = 0 : i64, tpu.core_type = #tpu.core_type<tc>, window_params = [{transform_indices = @transform_0, window_bounds = array<i64: 64, 40>}, {transform_indices = @transform_1, window_bounds = array<i64: 8, 80>}, {transform_indices = @transform_2, window_bounds = array<i64: 64, 1>}, {pipeline_mode = #tpu.pipeline_mode<synchronous>, transform_indices = @transform_3, window_bounds = array<i64: 64, 8>}, {pipeline_mode = #tpu.pipeline_mode<synchronous>, transform_indices = @transform_4, window_bounds = array<i64: 8, 64>}, {pipeline_mode = #tpu.pipeline_mode<synchronous>, transform_indices = @transform_5, window_bounds = array<i64: 2, 8>}, {pipeline_mode = #tpu.pipeline_mode<synchronous>, transform_indices = @transform_6, window_bounds = array<i64: 40, 80>}, {pipeline_mode = #tpu.pipeline_mode<synchronous>, transform_indices = @transform_7, window_bounds = array<i64: 1, 80>}, {pipeline_mode = #tpu.pipeline_mode<synchronous>, transform_indices = @transform_8, window_bounds = array<i64: 1, 1>}, {transform_indices = @transform_9, window_bounds = array<i64: 2, 40>}]} {
    %c0 = arith.constant 0 : index
    %c0_0 = arith.constant 0 : index
    %0 = vector.load %arg1[%c0, %c0_0] : memref<64x40xf32, #tpu.memory_space<vmem>>, vector<64x40xf32>
    %c0_1 = arith.constant 0 : index
    %c0_2 = arith.constant 0 : index
    %1 = vector.load %arg7[%c0_1, %c0_2] : memref<40x80xf32, #tpu.memory_space<vmem>>, vector<40x80xf32>
    %cst = arith.constant dense<0.000000e+00> : vector<64x80xf32>
    %2 = tpu.matmul %0, %1, %cst {dimension_numbers = #tpu.dot_dimension_numbers<[1], [0], [0], [1], [0, 0, 1, 1], [], []>} : vector<64x40xf32>, vector<40x80xf32>, vector<64x80xf32> -> vector<64x80xf32>
    %c0_3 = arith.constant 0 : index
    %c0_4 = arith.constant 0 : index
    %3 = vector.load %arg4[%c0_3, %c0_4] : memref<64x8xf32, #tpu.memory_space<vmem>>, vector<64x8xf32>
    %c0_5 = arith.constant 0 : index
    %c0_6 = arith.constant 0 : index
    %4 = vector.load %arg2[%c0_5, %c0_6] : memref<8x80xf32, #tpu.memory_space<vmem>>, vector<8x80xf32>
    %cst_7 = arith.constant dense<0.000000e+00> : vector<64x80xf32>
    %5 = tpu.matmul %3, %4, %cst_7 {dimension_numbers = #tpu.dot_dimension_numbers<[1], [0], [0], [1], [0, 0, 1, 1], [], []>} : vector<64x8xf32>, vector<8x80xf32>, vector<64x80xf32> -> vector<64x80xf32>
    %6 = arith.addf %2, %5 : vector<64x80xf32>
    %cst_8 = arith.constant 0.000000e+00 : f32
    %7 = vector.broadcast %cst_8 : f32 to vector<64x80xf32>
    %8 = arith.maximumf %6, %7 : vector<64x80xf32>
    %c0_9 = arith.constant 0 : index
    %c0_10 = arith.constant 0 : index
    %9 = vector.load %arg8[%c0_9, %c0_10] : memref<1x80xf32, #tpu.memory_space<vmem>>, vector<1x80xf32>
    %10 = vector.broadcast %9 : vector<1x80xf32> to vector<64x80xf32>
    %11 = arith.mulf %8, %10 : vector<64x80xf32>
    %cst_11 = arith.constant dense<0.000000e+00> : vector<64xf32>
    %12 = vector.multi_reduction <add>, %11, %cst_11 [1] : vector<64x80xf32> to vector<64xf32>
    %13 = vector.shape_cast %12 : vector<64xf32> to vector<64x1xf32>
    %c0_12 = arith.constant 0 : index
    %c0_13 = arith.constant 0 : index
    %14 = vector.load %arg9[%c0_12, %c0_13] : memref<1x1xf32, #tpu.memory_space<vmem>>, vector<1x1xf32>
    %15 = vector.broadcast %14 : vector<1x1xf32> to vector<64x1xf32>
    %16 = arith.addf %13, %15 : vector<64x1xf32>
    %c0_14 = arith.constant 0 : index
    %c0_15 = arith.constant 0 : index
    %17 = vector.load %arg3[%c0_14, %c0_15] : memref<64x1xf32, #tpu.memory_space<vmem>>, vector<64x1xf32>
    %cst_16 = arith.constant 0.000000e+00 : f32
    %18 = vector.broadcast %cst_16 : f32 to vector<64x1xf32>
    %19 = arith.cmpf one, %17, %18 : vector<64x1xf32>
    %cst_17 = arith.constant -1.07374182E+9 : f32
    %20 = vector.broadcast %cst_17 : f32 to vector<64x1xf32>
    %21 = arith.select %19, %16, %20 : vector<64x1xi1>, vector<64x1xf32>
    %cst_18 = arith.constant dense<0xFF800000> : vector<1xf32>
    %22 = vector.multi_reduction <maximumf>, %21, %cst_18 [0] : vector<64x1xf32> to vector<1xf32>
    %23 = vector.shape_cast %22 : vector<1xf32> to vector<1x1xf32>
    %24 = vector.broadcast %23 : vector<1x1xf32> to vector<64x1xf32>
    %25 = arith.subf %21, %24 : vector<64x1xf32>
    %26 = math.exp %25 : vector<64x1xf32>
    %c0_19 = arith.constant 0 : index
    %c0_20 = arith.constant 0 : index
    %27 = vector.load %arg5[%c0_19, %c0_20] : memref<8x64xf32, #tpu.memory_space<vmem>>, vector<8x64xf32>
    %cst_21 = arith.constant dense<0.000000e+00> : vector<8x1xf32>
    %28 = tpu.matmul %27, %26, %cst_21 {dimension_numbers = #tpu.dot_dimension_numbers<[1], [0], [0], [1], [0, 0, 1, 1], [], []>} : vector<8x64xf32>, vector<64x1xf32>, vector<8x1xf32> -> vector<8x1xf32>
    %c0_22 = arith.constant 0 : index
    %c0_23 = arith.constant 0 : index
    %29 = vector.load %arg5[%c0_22, %c0_23] : memref<8x64xf32, #tpu.memory_space<vmem>>, vector<8x64xf32>
    %30 = vector.broadcast %26 : vector<64x1xf32> to vector<64x40xf32>
    %31 = arith.mulf %30, %0 : vector<64x40xf32>
    %cst_24 = arith.constant dense<0.000000e+00> : vector<8x40xf32>
    %32 = tpu.matmul %29, %31, %cst_24 {dimension_numbers = #tpu.dot_dimension_numbers<[1], [0], [0], [1], [0, 0, 1, 1], [], []>} : vector<8x64xf32>, vector<64x40xf32>, vector<8x40xf32> -> vector<8x40xf32>
    %33 = vector.broadcast %28 : vector<8x1xf32> to vector<8x40xf32>
    %34 = arith.divf %32, %33 : vector<8x40xf32>
    %c0_25 = arith.constant 0 : index
    %c0_26 = arith.constant 0 : index
    %35 = vector.load %arg6[%c0_25, %c0_26] : memref<2x8xf32, #tpu.memory_space<vmem>>, vector<2x8xf32>
    %cst_27 = arith.constant dense<0.000000e+00> : vector<2x40xf32>
    %36 = tpu.matmul %35, %34, %cst_27 {dimension_numbers = #tpu.dot_dimension_numbers<[1], [0], [0], [1], [0, 0, 1, 1], [], []>} : vector<2x8xf32>, vector<8x40xf32>, vector<2x40xf32> -> vector<2x40xf32>
    %c0_28 = arith.constant 0 : index
    %c0_29 = arith.constant 0 : index
    %37 = vector.load %arg10[%c0_28, %c0_29] : memref<2x40xf32, #tpu.memory_space<vmem>>, vector<2x40xf32>
    tpu.vector_store %arg10[%c0_28, %c0_29], %36 {strides = array<i32>} : memref<2x40xf32, #tpu.memory_space<vmem>>, vector<2x40xf32>,
    return
  }
  func.func @transform_0(%arg0: i32) -> (i32, i32) {
    %c0_i32 = arith.constant 0 : i32
    %c0_i32_0 = arith.constant 0 : i32
    return %arg0, %c0_i32 : i32, i32
  }
  func.func @transform_1(%arg0: i32) -> (i32, i32) {
    %c0_i32 = arith.constant 0 : i32
    %c0_i32_0 = arith.constant 0 : i32
    return %arg0, %c0_i32 : i32, i32
  }
  func.func @transform_2(%arg0: i32) -> (i32, i32) {
    %c0_i32 = arith.constant 0 : i32
    %c0_i32_0 = arith.constant 0 : i32
    return %arg0, %c0_i32 : i32, i32
  }
  func.func @transform_3(%arg0: i32) -> (i32, i32) {
    %c0_i32 = arith.constant 0 : i32
    %c0_i32_0 = arith.constant 0 : i32
    %c0_i32_1 = arith.constant 0 : i32
    return %c0_i32, %c0_i32_0 : i32, i32
  }
  func.func @transform_4(%arg0: i32) -> (i32, i32) {
    %c0_i32 = arith.constant 0 : i32
    %c0_i32_0 = arith.constant 0 : i32
    %c0_i32_1 = arith.constant 0 : i32
    return %c0_i32, %c0_i32_0 : i32, i32
  }
  func.func @transform_5(%arg0: i32) -> (i32, i32) {
    %c0_i32 = arith.constant 0 : i32
    %c0_i32_0 = arith.constant 0 : i32
    %c0_i32_1 = arith.constant 0 : i32
    return %c0_i32, %c0_i32_0 : i32, i32
  }
  func.func @transform_6(%arg0: i32) -> (i32, i32) {
    %c0_i32 = arith.constant 0 : i32
    %c0_i32_0 = arith.constant 0 : i32
    %c0_i32_1 = arith.constant 0 : i32
    return %c0_i32, %c0_i32_0 : i32, i32
  }
  func.func @transform_7(%arg0: i32) -> (i32, i32) {
    %c0_i32 = arith.constant 0 : i32
    %c0_i32_0 = arith.constant 0 : i32
    %c0_i32_1 = arith.constant 0 : i32
    return %c0_i32, %c0_i32_0 : i32, i32
  }
  func.func @transform_8(%arg0: i32) -> (i32, i32) {
    %c0_i32 = arith.constant 0 : i32
    %c0_i32_0 = arith.constant 0 : i32
    %c0_i32_1 = arith.constant 0 : i32
    return %c0_i32, %c0_i32_0 : i32, i32
  }
  func.func @transform_9(%arg0: i32) -> (i32, i32) {
    %c0_i32 = arith.constant 0 : i32
    %c0_i32_0 = arith.constant 0 : i32
    return %arg0, %c0_i32 : i32, i32
  }
}

</mosaic_0001>

<bundles_post_ra>
// kernel: tpu_custom_call.1
= control target key start
LH: loop header
LB: loop body
LE: loop exit
PB: predicated region body
PF: predicated region fallthrough
CT: control target
= control target key end

     0   :  { %s1177_s0 = inlined_call_operand.vmem [shape: f32[64,40], index: 0, kind: input, shape index: {}]   ;;  %s1178_s1 = inlined_call_operand.vmem [shape: f32[8,80], index: 1, kind: input, shape index: {}]   ;;  %s1179_s2 = inlined_call_operand.vmem [shape: f32[64,1], index: 2, kind: input, shape index: {}]   ;;  %s1180_s3 = inlined_call_operand.vmem [shape: f32[64,8], index: 3, kind: input, shape index: {}]   ;;  %s1181_s4 = inlined_call_operand.vmem [shape: f32[8,64], index: 4, kind: input, shape index: {}]   ;;  %s1182_s5 = inlined_call_operand.vmem [shape: f32[2,8], index: 5, kind: input, shape index: {}]   ;;  %s1183_s6 = inlined_call_operand.vmem [shape: f32[40,80], index: 6, kind: input, shape index: {}]   ;;  %s1184_s7 = inlined_call_operand.vmem [shape: f32[1,80], index: 7, kind: input, shape index: {}]   ;;  %s1185_s8 = inlined_call_operand.<no memory space> [shape: f32[1,1], index: 8, kind: input, shape index: {}]   ;;  %s1186_s9 = inlined_call_operand.hbm [shape: f32[2,40], index: 9, kind: output, shape index: {}]  }
   0x1   :  { %v14_v0 = vstv %s1185_s8 }
   0x2   :  { %15 = vst [vmem:[#allocation2] sm:$0x1] %v14_v0 }
   0x3   :  { %v47_v1 = vld [vmem:[%s1183_s6 + $0x20] sm:$0xff]  ;;  %v46_v2 = vld [vmem:[%s1183_s6 + $0x18] sm:$0xff]  ;;  %vm57_vm0 = vcmask 64512   ;;  %v45_v5 = vld [vmem:[%s1183_s6 + $0x10] sm:$0xff]  ;;  %vm187_vm1 = vcmask 326656  }
   0x4   :  { %817 = vmatprep.subr.mxu1 %v47_v1  ;;  %v56_v3 = vld [vmem:[%s1178_s1] sm:$0xff]  ;;  %v49_v6 = vld [vmem:[%s1180_s3 + $0x8] sm:$0xff]  ;;  %v50_v9 = vld [vmem:[%s1180_s3 + $0x10] sm:$0xff] }
   0x5   :  { %v48_v4 = vld [vmem:[%s1180_s3] sm:$0xff]  ;;  %818 = vmatpush3.msra.mxu1 %v47_v1  ;;  %803 = vmatprep.subr.mxu0 %v56_v3  ;;  %v44_v8 = vld [vmem:[%s1183_s6 + $0x8] sm:$0xff]  ;;  %v51_v11 = vld [vmem:[%s1180_s3 + $0x18] sm:$0xff] }
   0x6   :  { %819 = vmatprep.subr.mxu1 %v46_v2  ;;  %804 = vmatpush3.msra.mxu0 %v56_v3  ;;  %v1006_v7 = vld [vmem:[%s1177_s0] sm:$0xff] }
   0x7   :  { %820 = vmatpush3.msra.mxu1 %v46_v2  ;;  %805 = vmatprep.mubr.msk.f32.mxu0 %vm57_vm0, %v48_v4  ;;  %v43_v10 = vld [vmem:[%s1183_s6] sm:$0xff] }
   0x8   :  { %821 = vmatprep.subr.mxu1 %v45_v5  ;;  %806 = vmatmul.mubr.msk.f32.vlgmr.msra.gmra.mxu0 %vm57_vm0, %v49_v6  ;;  %v52_v12 = vld [vmem:[%s1180_s3 + $0x20] sm:$0xff] }
   0x9   :  { %822 = vmatpush3.msra.mxu1 %v45_v5  ;;  %827 = vmatprep.mubr.msk.f32.mxu1 %vm187_vm1, %v1006_v7 }
   0xa   :  { %823 = vmatprep.subr.mxu1 %v44_v8  ;;  %808 = vmatprep.mubr.msk.f32.mxu0 %vm57_vm0, %v50_v9 }
   0xb   :  { %16 = vsyncpa [#allocation4], 0  ;;  %824 = vmatpush3.msra.mxu1 %v44_v8  ;;  %v1031_v13 = vld [vmem:[%s1177_s0 + $0x8] sm:$0xff]  ;;  %v1037_v14 = vld [vmem:[%s1177_s0 + $0x10] sm:$0xff]  ;;  %vm340_vm2 = vcmask 654336   ;;  %v928_v9 = vmov 0  }
   0xc   :  { %825 = vmatprep.subr.mxu1 %v43_v10  ;;  %809 = vmatmul.mubr.msk.f32.gmra.mxu0 %vm57_vm0, %v51_v11  ;;  %v53_v15 = vld [vmem:[%s1180_s3 + $0x28] sm:$0xff]  ;;  %v54_v16 = vld [vmem:[%s1180_s3 + $0x30] sm:$0xff]  ;;  %v1053_v17 = vld [vmem:[%s1177_s0 + $0x18] sm:$0xff]  ;;  %vm930_vm3 = vmmov 0   ;;  %vm404_vm8 = vcmask 7168   ;;  %vm451_vm13 = vcmask 523264  }
   0xd   :  { %826 = vmatpush3.msra.mxu1 %v43_v10  ;;  %811 = vmatprep.mubr.msk.f32.mxu0 %vm57_vm0, %v52_v12  ;;  %v1058_v18 = vld [vmem:[%s1177_s0 + $0x20] sm:$0xff]  ;;  %v55_v19 = vld [vmem:[%s1180_s3 + $0x38] sm:$0xff]  ;;  %v1072_v20 = vld [vmem:[%s1177_s0 + $0x28] sm:$0xff]  ;;  %v929_v10 = vmov 0.0   ;;  %s931_s23 = smov [#allocation3]   ;;  %vm724_vm14 = vcmask 320512  }
   0xe   :  { %828 = vmatmul.mubr.msk.f32.vlgmr.msra.gmra.mxu1 %vm187_vm1, %v1031_v13  ;;  %v1077_v21 = vld [vmem:[%s1177_s0 + $0x30] sm:$0xff]  ;;  %v1087_v22 = vld [vmem:[%s1177_s0 + $0x38] sm:$0xff]  ;;  %v756_v31 = vld [vmem:[%s1184_s7] ss:$0 sm:$0xff]  ;;  %887 = vset.pattern.permute.xlu1 %v928_v9  ;;  %s732_s1 = sshll.u32 %s931_s23, 4  ;;  %s733_s1 = int_to_ptr.vmem [resolvable:$true] %s732_s1 }
   0xf   :  { %830 = vmatprep.mubr.msk.f32.mxu1 %vm187_vm1, %v1037_v14  ;;  %886 = vset.pattern.permute.xlu0 %v928_v9  ;;  %s906_s24 = scalar_lea.vmem %s733_s1, 32  ;;  %p911_p1 = scmp.lt.s32.totalorder %s733_s1, %s733_s1 }
  0x10   :  { %812 = vmatmul.mubr.msk.f32.gmra.mxu0 %vm57_vm0, %v53_v15  ;;  %839 = vmatprep.subr.mxu0 %v929_v10  ;;  %p907_p0 = scmp.ne.s32.totalorder %s733_s1, %s906_s24  ;;  %p912_p2 = scmp.lt.s32.totalorder %s906_s24, %s906_s24 }
  0x11   :  { %814 = vmatprep.mubr.msk.f32.mxu0 %vm57_vm0, %v54_v16  ;;  %858 = vmatprep.subr.mxu1 %v929_v10  ;;  %v757_v16 = vld [vmem:[#allocation2] ss:$0 sm:$0xff] }
  0x12   :  { %831 = vmatmul.mubr.msk.f32.gmra.mxu1 %vm187_vm1, %v1053_v17  ;;  %p913_p3 = por %p912_p2, %p911_p1 }
  0x13   :  { %833 = vmatprep.mubr.msk.f32.mxu1 %vm187_vm1, %v1058_v18 }
  0x14   :  { %815 = vmatmul.mubr.msk.f32.gmra.mxu0 %vm57_vm0, %v55_v19  ;;  %p914_p4 = pnand %p913_p3, %p907_p0 }
  0x15   :  { %855 = vmatprep.mubr.msk.f32.mxu0 %vm930_vm3, %v929_v10 }
  0x16   :  { %834 = vmatmul.mubr.msk.f32.gmra.mxu1 %vm187_vm1, %v1072_v20 }
  0x17   :  { %836 = vmatprep.mubr.msk.f32.mxu1 %vm187_vm1, %v1077_v21 }
  0x1a   :  { %837 = vmatmul.mubr.msk.f32.gmra.mxu1 %vm187_vm1, %v1087_v22 }
  0x1b   :  { %874 = vmatprep.mubr.msk.f32.mxu1 %vm930_vm3, %v929_v10 }
  0xc8   :  { %v807_v23 = vpop.f32.mrf.mxu0 }
  0xca   :  { %v148_v24 = vpop.f32.mrf.mxu0 }
  0xcc   :  { %v810_v25 = vpop.f32.mrf.mxu0 }
  0xce   :  { %v829_v26 = vpop.f32.mrf.mxu1  ;;  %v158_v27 = vpop.f32.mrf.mxu0 }
  0xcf   :  { %v284_v28 = vadd.f32 %v829_v26, %v807_v23  ;;  %v381_v23 = vld [vmem:[%s1179_s2 + $0x8] sm:$0xff]  ;;  %v383_v26 = vld [vmem:[%s1179_s2 + $0x18] sm:$0xff] }
  0xd0   :  { %v278_v29 = vpop.f32.mrf.mxu1  ;;  %v813_v30 = vpop.f32.mrf.mxu0  ;;  %vm389_vm4 = vcmp.ne.f32.partialorder %v381_v23, 0.0  ;;  %vm391_vm7 = vcmp.ne.f32.partialorder %v383_v26, 0.0 }
  0xd1   :  { %v318_v32 = vmax.f32 %v284_v28, 0.0  ;;  %v279_v33 = vadd.f32 %v278_v29, %v148_v24  ;;  %v384_v24 = vld [vmem:[%s1179_s2 + $0x20] sm:$0xff] }
  0xd2   :  { %v832_v34 = vpop.f32.mrf.mxu1  ;;  %v168_v35 = vpop.f32.mrf.mxu0  ;;  %v380_v29 = vld [vmem:[%s1179_s2] sm:$0xff]  ;;  %vm392_vm5 = vcmp.ne.f32.partialorder %v384_v24, 0.0 }
  0xd3   :  { %v317_v36 = vmax.f32 %v279_v33, 0.0  ;;  %v294_v37 = vadd.f32 %v832_v34, %v810_v25  ;;  %v333_v38 = vmul.f32 %v756_v31, %v318_v32  ;;  %v385_v25 = vld [vmem:[%s1179_s2 + $0x28] sm:$0xff]  ;;  %v386_v32 = vld [vmem:[%s1179_s2 + $0x30] sm:$0xff]  ;;  %vm388_vm9 = vcmp.ne.f32.partialorder %v380_v29, 0.0 }
  0xd4   :  { %v288_v39 = vpop.f32.mrf.mxu1  ;;  %v816_v45 = vpop.f32.mrf.mxu0  ;;  %vm393_vm6 = vcmp.ne.f32.partialorder %v385_v25, 0.0  ;;  %vm394_vm11 = vcmp.ne.f32.partialorder %v386_v32, 0.0 }
  0xd5   :  { %v320_v40 = vmax.f32 %v294_v37, 0.0  ;;  %v289_v41 = vadd.f32 %v288_v39, %v158_v27  ;;  %v344_v42 = vsel %vm340_vm2, %v333_v38, 0.0  ;;  %v332_v43 = vmul.f32 %v756_v31, %v317_v36  ;;  %v387_v38 = vld [vmem:[%s1179_s2 + $0x38] sm:$0xff] }
  0xd6   :  { %345 = vadd.xlane.f32.xlu0 %v344_v42  ;;  %v835_v44 = vpop.f32.mrf.mxu1  ;;  %v178_v56 = vpop.f32.mrf.mxu0  ;;  %vm395_vm12 = vcmp.ne.f32.partialorder %v387_v38, 0.0 }
  0xd7   :  { %v319_v46 = vmax.f32 %v289_v41, 0.0  ;;  %v304_v47 = vadd.f32 %v835_v44, %v813_v30  ;;  %v335_v48 = vmul.f32 %v756_v31, %v320_v40  ;;  %v341_v50 = vsel %vm340_vm2, %v332_v43, 0.0  ;;  %v382_v30 = vld [vmem:[%s1179_s2 + $0x10] sm:$0xff] }
  0xd8   :  { %v298_v49 = vpop.f32.mrf.mxu1  ;;  %vm390_vm10 = vcmp.ne.f32.partialorder %v382_v30, 0.0 }
  0xd9   :  { %v322_v51 = vmax.f32 %v304_v47, 0.0  ;;  %v299_v52 = vadd.f32 %v298_v49, %v168_v35  ;;  %v350_v53 = vsel %vm340_vm2, %v335_v48, 0.0  ;;  %v334_v54 = vmul.f32 %v756_v31, %v319_v46 }
  0xda   :  { %351 = vadd.xlane.f32.xlu1 %v350_v53  ;;  %v838_v55 = vpop.f32.mrf.mxu1  ;;  %342 = vadd.xlane.f32.xlu0 %v341_v50 }
  0xdb   :  { %v321_v57 = vmax.f32 %v299_v52, 0.0  ;;  %v314_v58 = vadd.f32 %v838_v55, %v816_v45  ;;  %v347_v60 = vsel %vm340_vm2, %v334_v54, 0.0  ;;  %v337_v0 = vmul.f32 %v756_v31, %v322_v51 }
  0xdc   :  { %v308_v59 = vpop.f32.mrf.mxu1 }
  0xdd   :  { %v324_v61 = vmax.f32 %v314_v58, 0.0  ;;  %v309_v62 = vadd.f32 %v308_v59, %v178_v56  ;;  %v336_v63 = vmul.f32 %v756_v31, %v321_v57  ;;  %v356_v3 = vsel %vm340_vm2, %v337_v0, 0.0 }
  0xde   :  { %348 = vadd.xlane.f32.xlu1 %v347_v60 }
  0xdf   :  { %v323_v1 = vmax.f32 %v309_v62, 0.0  ;;  %v353_v2 = vsel %vm340_vm2, %v336_v63, 0.0  ;;  %v339_v5 = vmul.f32 %v756_v31, %v324_v61 }
  0xe0   :  { %354 = vadd.xlane.f32.xlu0 %v353_v2 }
  0xe1   :  { %v338_v4 = vmul.f32 %v756_v31, %v323_v1  ;;  %v362_v8 = vsel %vm340_vm2, %v339_v5, 0.0 }
  0xe2   :  { %357 = vadd.xlane.f32.xlu1 %v356_v3 }
  0xe3   :  { %v359_v6 = vsel %vm340_vm2, %v338_v4, 0.0 }
  0xe4   :  { %360 = vadd.xlane.f32.xlu0 %v359_v6 }
  0xe6   :  { %363 = vadd.xlane.f32.xlu1 %v362_v8 }
 0x15f   :  { %v346_v11 = vpop.xlane.xlu0 %345 }
 0x160   :  { %v373_v28 = vadd.f32 %v757_v16, %v346_v11 }
 0x162   :  { %v397_v40 = vsel %vm389_vm4, %v373_v28, -1.0737418e+09 }
 0x163   :  { %v352_v12 = vpop.xlane.xlu1 %351  ;;  %v343_v15 = vpop.xlane.xlu0 %342  ;;  %v406_v51 = vsel %vm404_vm8, %v397_v40, -inf }
 0x164   :  { %v375_v33 = vadd.f32 %v757_v16, %v352_v12  ;;  %v372_v35 = vadd.f32 %v757_v16, %v343_v15 }
 0x166   :  { %v399_v44 = vsel %vm391_vm7, %v375_v33, -1.0737418e+09  ;;  %v396_v47 = vsel %vm388_vm9, %v372_v35, -1.0737418e+09 }
 0x167   :  { %v349_v19 = vpop.xlane.xlu1 %348  ;;  %v408_v56 = vsel %vm404_vm8, %v399_v44, -inf  ;;  %v405_v57 = vsel %vm404_vm8, %v396_v47, -inf }
 0x168   :  { %v374_v36 = vadd.f32 %v757_v16, %v349_v19 }
 0x169   :  { %v355_v27 = vpop.xlane.xlu0 %354 }
 0x16a   :  { %v376_v31 = vadd.f32 %v757_v16, %v355_v27  ;;  %v398_v48 = vsel %vm390_vm10, %v374_v36, -1.0737418e+09 }
 0x16b   :  { %v358_v34 = vpop.xlane.xlu1 %357  ;;  %v407_v58 = vsel %vm404_vm8, %v398_v48, -inf }
 0x16c   :  { %v377_v37 = vadd.f32 %v757_v16, %v358_v34  ;;  %v400_v41 = vsel %vm392_vm5, %v376_v31, -1.0737418e+09 }
 0x16d   :  { %v361_v39 = vpop.xlane.xlu0 %360  ;;  %v409_v52 = vsel %vm404_vm8, %v400_v41, -inf }
 0x16e   :  { %v401_v42 = vsel %vm393_vm6, %v377_v37, -1.0737418e+09  ;;  %v378_v43 = vadd.f32 %v757_v16, %v361_v39  ;;  %v410_v60 = vmax.f32 %v405_v57, %v409_v52 }
 0x16f   :  { %v411_v45 = vsel %vm404_vm8, %v401_v42, -inf  ;;  %v364_v46 = vpop.xlane.xlu1 %363 }
 0x170   :  { %v402_v49 = vsel %vm394_vm11, %v378_v43, -1.0737418e+09  ;;  %v379_v50 = vadd.f32 %v757_v16, %v364_v46  ;;  %v412_v54 = vmax.f32 %v406_v51, %v411_v45 }
 0x171   :  { %v413_v53 = vsel %vm404_vm8, %v402_v49, -inf }
 0x172   :  { %v403_v55 = vsel %vm395_vm12, %v379_v50, -1.0737418e+09  ;;  %v414_v61 = vmax.f32 %v407_v58, %v413_v53  ;;  %v417_v63 = vmax.f32 %v410_v60, %v412_v54 }
 0x173   :  { %v415_v59 = vsel %vm404_vm8, %v403_v55, -inf }
 0x174   :  { %v416_v62 = vmax.f32 %v408_v56, %v415_v59 }
 0x176   :  { %v418_v0 = vmax.f32 %v414_v61, %v416_v62 }
 0x178   :  { %v419_v1 = vmax.f32 %v417_v63, %v418_v0 }
 0x17a   :  { %v420_v2 = vrot.slane %v419_v1, 4 }
 0x17c   :  { %v421_v3 = vmax.f32 %v419_v1, %v420_v2 }
 0x17e   :  { %v422_v4 = vrot.slane %v421_v3, 2 }
 0x180   :  { %v423_v5 = vmax.f32 %v421_v3, %v422_v4 }
 0x182   :  { %v424_v6 = vrot.slane %v423_v5, 1 }
 0x184   :  { %v425_v8 = vmax.f32 %v423_v5, %v424_v6 }
 0x186   :  { %v433_v9 = vsub.f32 %v403_v55, %v425_v8  ;;  %v432_v11 = vsub.f32 %v402_v49, %v425_v8  ;;  %v431_v15 = vsub.f32 %v401_v42, %v425_v8  ;;  %v430_v19 = vsub.f32 %v400_v41, %v425_v8 }
 0x187   :  { %v429_v23 = vsub.f32 %v399_v44, %v425_v8  ;;  %v428_v25 = vsub.f32 %v398_v48, %v425_v8  ;;  %v427_v27 = vsub.f32 %v397_v40, %v425_v8  ;;  %v426_v29 = vsub.f32 %v396_v47, %v425_v8  ;;  %v450_v40 = vld [vmem:[%s1181_s4] sm:$0xff] }
 0x188   :  { %v448_v12 = vmul.f32 1.442695, %v433_v9  ;;  %v446_v16 = vmul.f32 1.442695, %v432_v11  ;;  %v444_v24 = vmul.f32 1.442695, %v431_v15 }
 0x189   :  { %v442_v26 = vmul.f32 1.442695, %v430_v19  ;;  %v440_v28 = vmul.f32 1.442695, %v429_v23  ;;  %v438_v30 = vmul.f32 1.442695, %v428_v25 }
 0x18a   :  { %888 = vpow2.f32 %v448_v12  ;;  %v436_v31 = vmul.f32 1.442695, %v427_v27  ;;  %v434_v32 = vmul.f32 1.442695, %v426_v29 }
 0x18b   :  { %890 = vpow2.f32 %v446_v16 }
 0x18c   :  { %892 = vpow2.f32 %v444_v24 }
 0x18d   :  { %894 = vpow2.f32 %v442_v26 }
 0x18e   :  { %896 = vpow2.f32 %v440_v28 }
 0x18f   :  { %898 = vpow2.f32 %v438_v30 }
 0x190   :  { %900 = vpow2.f32 %v436_v31 }
 0x191   :  { %902 = vpow2.f32 %v434_v32 }
 0x197   :  { %v889_v33 = vpop.eup %888 }
 0x198   :  { %v891_v34 = vpop.eup %890  ;;  %562 = vperm.xlu0 %886, %v889_v33   ;;  %840 = vmatpush3.msra.mxu0 %v889_v33 }
 0x199   :  { %557 = vperm.xlu1 %887, %v891_v34   ;;  %841 = vmatprep.subr.mxu0 %v929_v10  ;;  %v893_v35 = vpop.eup %892 }
 0x19a   :  { %842 = vmatpush3.msra.mxu0 %v891_v34  ;;  %v895_v36 = vpop.eup %894 }
 0x19b   :  { %843 = vmatprep.subr.mxu0 %v929_v10  ;;  %v897_v37 = vpop.eup %896 }
 0x19c   :  { %844 = vmatpush3.msra.mxu0 %v893_v35  ;;  %v899_v38 = vpop.eup %898 }
 0x19d   :  { %552 = vperm.xlu1 %887, %v893_v35   ;;  %845 = vmatprep.subr.mxu0 %v929_v10  ;;  %v901_v39 = vpop.eup %900 }
 0x19e   :  { %846 = vmatpush3.msra.mxu0 %v895_v36  ;;  %v903_v41 = vpop.eup %902 }
 0x19f   :  { %847 = vmatprep.subr.mxu0 %v929_v10 }
 0x1a0   :  { %848 = vmatpush3.msra.mxu0 %v897_v37 }
 0x1a1   :  { %547 = vperm.xlu1 %887, %v895_v36   ;;  %849 = vmatprep.subr.mxu0 %v929_v10 }
 0x1a2   :  { %850 = vmatpush3.msra.mxu0 %v899_v38 }
 0x1a3   :  { %851 = vmatprep.subr.mxu0 %v929_v10 }
 0x1a4   :  { %852 = vmatpush3.msra.mxu0 %v901_v39 }
 0x1a5   :  { %542 = vperm.xlu1 %887, %v897_v37   ;;  %853 = vmatprep.subr.mxu0 %v929_v10 }
 0x1a6   :  { %854 = vmatpush3.msra.mxu0 %v903_v41 }
 0x1a7   :  { %856 = vmatmul.mubr.msk.f32.vlgmr.msra.gmra.mxu0 %vm451_vm13, %v450_v40  ;;  %877 = vmatprep.subr.mxu0 %v929_v10 }
 0x1a8   :  { %879 = vmatprep.mubr.msk.f32.mxu0 %vm930_vm3, %v929_v10 }
 0x1a9   :  { %537 = vperm.xlu1 %887, %v899_v38  }
 0x1ad   :  { %532 = vperm.xlu1 %887, %v901_v39  }
 0x1b1   :  { %527 = vperm.xlu1 %887, %v903_v41  }
 0x213   :  { %v563_v42 = vpop.permute.xlu0 %562 }
 0x214   :  { %v572_v43 = vmul.f32 %v563_v42, %v1087_v22  ;;  %v558_v44 = vpop.permute.xlu1 %557 }
 0x215   :  { %v571_v45 = vmul.f32 %v558_v44, %v1077_v21 }
 0x216   :  { %859 = vmatpush3.msra.mxu1 %v572_v43 }
 0x217   :  { %860 = vmatprep.subr.mxu1 %v929_v10 }
 0x218   :  { %v553_v46 = vpop.permute.xlu1 %552  ;;  %861 = vmatpush3.msra.mxu1 %v571_v45 }
 0x219   :  { %v570_v47 = vmul.f32 %v553_v46, %v1072_v20  ;;  %862 = vmatprep.subr.mxu1 %v929_v10 }
 0x21b   :  { %863 = vmatpush3.msra.mxu1 %v570_v47 }
 0x21c   :  { %v548_v48 = vpop.permute.xlu1 %547  ;;  %864 = vmatprep.subr.mxu1 %v929_v10 }
 0x21d   :  { %v569_v49 = vmul.f32 %v548_v48, %v1058_v18 }
 0x21f   :  { %865 = vmatpush3.msra.mxu1 %v569_v49 }
 0x220   :  { %v543_v22 = vpop.permute.xlu1 %542  ;;  %866 = vmatprep.subr.mxu1 %v929_v10 }
 0x221   :  { %v568_v21 = vmul.f32 %v543_v22, %v1053_v17 }
 0x223   :  { %867 = vmatpush3.msra.mxu1 %v568_v21 }
 0x224   :  { %v538_v50 = vpop.permute.xlu1 %537  ;;  %868 = vmatprep.subr.mxu1 %v929_v10 }
 0x225   :  { %v567_v20 = vmul.f32 %v538_v50, %v1037_v14 }
 0x227   :  { %869 = vmatpush3.msra.mxu1 %v567_v20 }
 0x228   :  { %v533_v51 = vpop.permute.xlu1 %532  ;;  %870 = vmatprep.subr.mxu1 %v929_v10 }
 0x229   :  { %v566_v52 = vmul.f32 %v533_v51, %v1031_v13  ;;  %v650_v13 = vld [vmem:[%s1182_s5] sm:$0x3] }
 0x22b   :  { %871 = vmatpush3.msra.mxu1 %v566_v52 }
 0x22c   :  { %v528_v18 = vpop.permute.xlu1 %527  ;;  %872 = vmatprep.subr.mxu1 %v929_v10 }
 0x22d   :  { %v565_v53 = vmul.f32 %v528_v18, %v1006_v7 }
 0x22f   :  { %873 = vmatpush3.msra.mxu1 %v565_v53 }
 0x230   :  { %875 = vmatmul.mubr.msk.f32.vlgmr.msra.gmra.mxu1 %vm451_vm13, %v450_v40 }
 0x267   :  { %v521_v17 = vpop.f32.mrf.mxu0 }
 0x268   :  { %645 = vperm.xlu1 %887, %v521_v17  }
 0x269   :  { %v857_v54 = vpop.f32.mrf.mxu0 }
 0x2e3   :  { %v646_v55 = vpop.permute.xlu1 %645 }
 0x2e4   :  { %904 = vrcp.f32 %v646_v55 }
 0x2f0   :  { %v639_v14 = vpop.f32.mrf.mxu1 }
 0x2f1   :  { %v905_v56 = vpop.eup %904 }
 0x2f2   :  { %v649_v57 = vmul.f32 %v905_v56, %v639_v14  ;;  %v876_v58 = vpop.f32.mrf.mxu1 }
 0x2f4   :  { %878 = vmatpush3.msra.mxu0 %v649_v57 }
 0x2f5   :  { %880 = vmatmul.mubr.msk.f32.vlgmr.msra.gmra.mxu0 %vm57_vm0, %v650_v13 }
 0x3b5   :  { %v720_v7 = vpop.f32.mrf.mxu0 }
 0x3b6   :  { %725 = vst.msk [vmem:[#allocation3] sm:$0x3] %vm724_vm14, %v720_v7 }
 0x3b7   :  { %v881_v10 = vpop.f32.mrf.mxu0 }
 0x3b8   :  { %917 = shalt.err (!%p914_p4)
}
 0x3b9   :  { %735 = dma.vmem_to_hbm [thread:$0]  %s733_s1, 32, %s1186_s9, [#allocation4]  }
 0x3ba   :  { %926 = dma.done.wait [#allocation4], 32  }
 0x3bb   :  { %927 = vsyncadd [#allocation4], 4294967264 }
 0x3bc   :  { %739 = vsyncpa [#allocation4], 1 }

</bundles_post_ra>
